<compile_context>
chip_gen: v5e
topology: v5e:2x2
jax: 0.10.0
libtpu: 0.0.40
codegen_flags: <defaults>
</compile_context>

<pallas_src>
import functools

import jax
import jax.numpy as jnp
from jax import lax
from jax.experimental import pallas as pl
from jax.experimental.pallas import tpu as pltpu

_LN_EPS = 1e-5  # torch.nn.LayerNorm default


def _round_up(x, m):
    return ((x + m - 1) // m) * m


def _pad2d(a, rows, cols, fill=0.0):
    r, c = a.shape
    if r == rows and c == cols:
        return a
    return jnp.pad(a, ((0, rows - r), (0, cols - c)), constant_values=fill)


def _layernorm_padded(h, gamma, beta, true_dim):
    """LayerNorm over the last dim where columns >= true_dim are exactly zero
    (zero-padded weights/bias guarantee this for both pre-LN activations).
    Matches torch.nn.LayerNorm (biased variance, eps=1e-5) on the real columns.
    Uses a scalar variance correction instead of an iota/where mask."""
    padded_dim = h.shape[-1]
    inv_n = 1.0 / float(true_dim)
    mean = jnp.sum(h, axis=-1, keepdims=True) * inv_n      # pads are 0 -> exact
    centered = h - mean
    sq = jnp.sum(centered * centered, axis=-1, keepdims=True)
    if padded_dim != true_dim:
        # padded columns contribute exactly mean^2 each to sq; subtract them.
        sq = sq - float(padded_dim - true_dim) * (mean * mean)
    var = sq * inv_n
    return centered * lax.rsqrt(var + _LN_EPS) * gamma + beta


def _mlp_kernel(x_ref, wA_ref, bA_ref, g1_ref, be1_ref,
                w2_ref, b2_ref, g2_ref, be2_ref, o_ref,
                *, hidden, hidden_p, cout, cout_p, has_sc, mm_dtype):
    xv = x_ref[...]                                   # (tm, cin), native dtype
    x_mm = xv if xv.dtype == mm_dtype else xv.astype(mm_dtype)

    # First matmul; a Linear shortcut's weights are fused as extra columns of wA
    # so both matmuls on x share one MXU pass: x @ [w1 | wsc].
    hs = jnp.dot(x_mm, wA_ref[...], preferred_element_type=jnp.float32) + bA_ref[...]

    if has_sc:
        h = hs[:, :hidden_p]
        sc = hs[:, hidden_p:]                         # (tm, cout_p), f32
    else:
        h = hs
        sc = xv.astype(jnp.float32)                   # identity shortcut
        cin = sc.shape[-1]
        if cin < cout_p:                              # widen to the padded output
            sc = jnp.concatenate(
                [sc, jnp.zeros((sc.shape[0], cout_p - cin), jnp.float32)], axis=-1)

    h = _layernorm_padded(h, g1_ref[...], be1_ref[...], hidden)
    h = jnp.maximum(h, 0.0)                           # ReLU

    y = jnp.dot(h.astype(mm_dtype), w2_ref[...],
                preferred_element_type=jnp.float32) + b2_ref[...]
    y = _layernorm_padded(y, g2_ref[...], be2_ref[...], cout)

    o_ref[...] = jnp.maximum(y + sc, 0.0).astype(o_ref.dtype)  # residual + ReLU


def init_params(key, in_channels, out_channels=None, hidden_channels=None,
                dtype=jnp.float32):
    """Synthetic init mirroring nn.Linear / nn.LayerNorm. Linear weights stored
    pre-transposed as [C_in, C_out]; per-feature params as [1, C]."""
    if hidden_channels is None:
        hidden_channels = in_channels
    if out_channels is None:
        out_channels = in_channels
    ks = jax.random.split(key, 6)
    s1 = 1.0 / jnp.sqrt(in_channels)
    s2 = 1.0 / jnp.sqrt(hidden_channels)
    params = {
        "w1": jax.random.uniform(ks[0], (in_channels, hidden_channels), dtype, -s1, s1),
        "b1": jax.random.uniform(ks[1], (1, hidden_channels), dtype, -s1, s1),
        "g1": jnp.ones((1, hidden_channels), dtype),
        "be1": jnp.zeros((1, hidden_channels), dtype),
        "w2": jax.random.uniform(ks[2], (hidden_channels, out_channels), dtype, -s2, s2),
        "b2": jax.random.uniform(ks[3], (1, out_channels), dtype, -s2, s2),
        "g2": jnp.ones((1, out_channels), dtype),
        "be2": jnp.zeros((1, out_channels), dtype),
    }
    if in_channels != out_channels:
        params["wsc"] = jax.random.uniform(
            ks[4], (in_channels, out_channels), dtype, -s1, s1)
        params["bsc"] = jax.random.uniform(
            ks[5], (1, out_channels), dtype, -s1, s1)
    return params


def prepare_params(params, *, matmul_dtype=None):
    """One-time weight preparation: f32 cast, zero-pad channel dims to 128,
    fuse [w1 | wsc], cast matmul operands to matmul_dtype. Returns
    (arrays_dict, meta_dict) — call this once and reuse for every forward."""
    cin, hidden = params["w1"].shape
    cout = params["w2"].shape[1]
    has_sc = "wsc" in params
    hidden_p = _round_up(hidden, 128)
    cout_p = _round_up(cout, 128)
    mm_dtype = (jnp.dtype(matmul_dtype) if matmul_dtype is not None
                else jnp.dtype(params["w1"].dtype))

    w1 = _pad2d(params["w1"].astype(jnp.float32), cin, hidden_p)
    b1 = _pad2d(params["b1"].astype(jnp.float32), 1, hidden_p)
    g1 = _pad2d(params["g1"].astype(jnp.float32), 1, hidden_p)
    be1 = _pad2d(params["be1"].astype(jnp.float32), 1, hidden_p)
    w2 = _pad2d(params["w2"].astype(jnp.float32), hidden_p, cout_p)
    b2 = _pad2d(params["b2"].astype(jnp.float32), 1, cout_p)
    g2 = _pad2d(params["g2"].astype(jnp.float32), 1, cout_p)
    be2 = _pad2d(params["be2"].astype(jnp.float32), 1, cout_p)

    if has_sc:
        wsc = _pad2d(params["wsc"].astype(jnp.float32), cin, cout_p)
        bsc = _pad2d(params["bsc"].astype(jnp.float32), 1, cout_p)
        w_first = jnp.concatenate([w1, wsc], axis=1)    # x @ [w1 | wsc] in one pass
        b_first = jnp.concatenate([b1, bsc], axis=1)
    else:
        w_first, b_first = w1, b1

    arrays = {
        "w_first": w_first.astype(mm_dtype),
        "b_first": b_first,
        "g1": g1, "be1": be1,
        "w2": w2.astype(mm_dtype),
        "b2": b2, "g2": g2, "be2": be2,
    }
    meta = {"cin": cin, "hidden": hidden, "hidden_p": hidden_p,
            "cout": cout, "cout_p": cout_p, "has_sc": has_sc,
            "mm_dtype": mm_dtype}
    return arrays, meta


def _const_spec(shape):
    """Full-array BlockSpec for grid-invariant operands; single-buffered since
    the block index never changes (falls back if pipeline_mode unsupported)."""
    try:
        return pl.BlockSpec(shape, lambda i: (0, 0), pipeline_mode=pl.Buffered(1))
    except (TypeError, AttributeError):
        return pl.BlockSpec(shape, lambda i: (0, 0))


def residual_mlp_block_prepared(x, arrays, meta, *, tm=1024):
    """Steady-state forward. x: [N, C_in] (features in the lane dim)."""
    N, cin = x.shape
    assert cin == meta["cin"], "x channel dim does not match prepared params"
    hidden, hidden_p = meta["hidden"], meta["hidden_p"]
    cout, cout_p = meta["cout"], meta["cout_p"]
    has_sc, mm_dtype = meta["has_sc"], meta["mm_dtype"]

    x_itemsize = jnp.dtype(x.dtype).itemsize
    A_cols = arrays["w_first"].shape[1]                 # hidden_p (+ cout_p if fused sc)
    wbytes = sum(int(a.size) * a.dtype.itemsize for a in arrays.values())

    # ---- row tiling: big tiles, rows padded, >=2 grid steps for v7x megacore ----
    rows = _round_up(N, 8)
    tm_eff = min(tm, rows)
    if rows > 256:
        tm_eff = min(tm_eff, max(256, _round_up(-(-rows // 2), 8)))

    def vmem_footprint(t):
        io = 2 * t * (cin + cout_p) * x_itemsize          # double-buffered x / out tiles
        inter = t * (cin + A_cols + hidden_p + 2 * cout_p) * 4  # f32 temporaries (upper bound)
        return io + wbytes + inter                        # weights single-buffered

    budget = 24 * 1024 * 1024   # fits v7x's 32 MiB scoped default with headroom
    while tm_eff > 64 and vmem_footprint(tm_eff) > budget:
        tm_eff = max(64, _round_up(tm_eff // 2, 8))

    n_pad = _round_up(N, tm_eff)
    x_p = x if n_pad == N else jnp.pad(x, ((0, n_pad - N), (0, 0)))
    grid = (n_pad // tm_eff,)

    kernel = functools.partial(
        _mlp_kernel, hidden=hidden, hidden_p=hidden_p, cout=cout, cout_p=cout_p,
        has_sc=has_sc, mm_dtype=mm_dtype)

    inputs = [x_p, arrays["w_first"], arrays["b_first"], arrays["g1"], arrays["be1"],
              arrays["w2"], arrays["b2"], arrays["g2"], arrays["be2"]]
    in_specs = ([pl.BlockSpec((tm_eff, cin), lambda i: (i, 0))]
                + [_const_spec(a.shape) for a in inputs[1:]])

    flops = 2 * N * (cin * hidden + hidden * cout + (cin * cout if has_sc else 0))
    bytes_accessed = (n_pad * cin * x_itemsize          # x read (actually DMA'd)
                      + n_pad * cout_p * x_itemsize     # padded lane-dense output write
                      + wbytes)
    cost = pl.CostEstimate(flops=int(flops), transcendentals=int(2 * N),
                           bytes_accessed=int(bytes_accessed))

    vmem_limit = int(min(max(vmem_footprint(tm_eff) + (4 << 20), 32 << 20), 64 << 20))

    out_p = pl.pallas_call(
        kernel,
        out_shape=jax.ShapeDtypeStruct((n_pad, cout_p), x.dtype),
        grid_spec=pltpu.PrefetchScalarGridSpec(
            num_scalar_prefetch=0,
            grid=grid,
            in_specs=in_specs,
            out_specs=pl.BlockSpec((tm_eff, cout_p), lambda i: (i, 0)),
        ),
        compiler_params=pltpu.CompilerParams(
            dimension_semantics=("parallel",),
            vmem_limit_bytes=vmem_limit),
        cost_estimate=cost,
    )(*inputs)

    return out_p[:N, :cout]


def residual_mlp_block(x, params, *, tm=1024, matmul_dtype=None):
    """Convenience wrapper: per-call prep + forward. For repeated calls use
    prepare_params() once and residual_mlp_block_prepared().
    Note: on TPU v5e pass matmul_dtype=jnp.bfloat16 (no native f32 MXU path)."""
    mm = matmul_dtype if matmul_dtype is not None else x.dtype
    arrays, meta = prepare_params(params, matmul_dtype=mm)
    return residual_mlp_block_prepared(x, arrays, meta, tm=tm)


def residual_mlp_block_ref(x, params):
    """Pure-JAX reference (mirrors the PyTorch forward)."""
    def ln(h, g, b):
        m = jnp.mean(h, axis=-1, keepdims=True)
        v = jnp.mean((h - m) ** 2, axis=-1, keepdims=True)
        return (h - m) / jnp.sqrt(v + _LN_EPS) * g + b

    h = jax.nn.relu(ln(x @ params["w1"] + params["b1"], params["g1"], params["be1"]))
    y = ln(h @ params["w2"] + params["b2"], params["g2"], params["be2"])
    sc = x @ params["wsc"] + params["bsc"] if "wsc" in params else x
    return jax.nn.relu(y + sc)


if __name__ == "__main__":
    key = jax.random.PRNGKey(0)
    k_x, k_p1, k_x2, k_p2 = jax.random.split(key, 4)

    # Case 1: ResidualMLPBlock(32, hidden_features=64) -> identity shortcut.
    # Uses the steady-state path: prepare once, call the prepared forward.
    N, cin, hidden = 64, 32, 64
    x = jax.random.normal(k_x, (N, cin), jnp.float32)
    params = init_params(k_p1, cin, out_channels=None, hidden_channels=hidden)
    arrays, meta = prepare_params(params)
    out = residual_mlp_block_prepared(x, arrays, meta)
    jax.block_until_ready(out)
    ref = residual_mlp_block_ref(x, params)
    assert out.shape == (N, cin)
    assert jnp.allclose(out, ref, atol=1e-4, rtol=1e-4), "identity-shortcut mismatch"

    # Case 2: ResidualMLPBlock(32, out_features=16, hidden_features=64) -> Linear
    # shortcut, ragged row count exercises the padded-row tail path.
    N2, cout2 = 200, 16
    x2 = jax.random.normal(k_x2, (N2, cin), jnp.float32)
    params2 = init_params(k_p2, cin, out_channels=cout2, hidden_channels=hidden)
    out2 = residual_mlp_block(x2, params2)
    jax.block_until_ready(out2)
    ref2 = residual_mlp_block_ref(x2, params2)
    assert out2.shape == (N2, cout2)
    assert jnp.allclose(out2, ref2, atol=1e-4, rtol=1e-4), "linear-shortcut mismatch"

    # Case 3: bf16 matmul operands (recommended on v5e), f32 LayerNorm/residual.
    out3 = residual_mlp_block(x, params, matmul_dtype=jnp.bfloat16)
    jax.block_until_ready(out3)
    assert out3.shape == (N, cin)
    assert bool(jnp.all(jnp.isfinite(out3)))
    assert float(jnp.max(jnp.abs(out3 - ref))) < 0.25, "bf16-matmul path too far off"

    # TODO(synk): the Geometry wrapper (x.replace(batched_features=...)) is container
    # bookkeeping with no compute; only the feature-tensor path is implemented.
    print("KERNEL_OK")
</pallas_src>

<mosaic_0001>
module attributes {stable_mosaic.version = 11 : i64} {
  func.func @_mlp_kernel(%arg0: i32, %arg1: memref<64x32xf32, #tpu.memory_space<vmem>>, %arg2: memref<32x128xf32, #tpu.memory_space<vmem>>, %arg3: memref<1x128xf32, #tpu.memory_space<vmem>>, %arg4: memref<1x128xf32, #tpu.memory_space<vmem>>, %arg5: memref<1x128xf32, #tpu.memory_space<vmem>>, %arg6: memref<128x128xf32, #tpu.memory_space<vmem>>, %arg7: memref<1x128xf32, #tpu.memory_space<vmem>>, %arg8: memref<1x128xf32, #tpu.memory_space<vmem>>, %arg9: memref<1x128xf32, #tpu.memory_space<vmem>>, %arg10: memref<64x128xf32, #tpu.memory_space<vmem>>) attributes {dimension_semantics = [#tpu.dimension_semantics<parallel>], iteration_bounds = array<i64: 1>, scalar_prefetch = 0 : i64, scratch_operands = 0 : i64, tpu.core_type = #tpu.core_type<tc>, window_params = [{transform_indices = @transform_0, window_bounds = array<i64: 64, 32>}, {pipeline_mode = #tpu.pipeline_mode<synchronous>, transform_indices = @transform_1, window_bounds = array<i64: 32, 128>}, {pipeline_mode = #tpu.pipeline_mode<synchronous>, transform_indices = @transform_2, window_bounds = array<i64: 1, 128>}, {pipeline_mode = #tpu.pipeline_mode<synchronous>, transform_indices = @transform_3, window_bounds = array<i64: 1, 128>}, {pipeline_mode = #tpu.pipeline_mode<synchronous>, transform_indices = @transform_4, window_bounds = array<i64: 1, 128>}, {pipeline_mode = #tpu.pipeline_mode<synchronous>, transform_indices = @transform_5, window_bounds = array<i64: 128, 128>}, {pipeline_mode = #tpu.pipeline_mode<synchronous>, transform_indices = @transform_6, window_bounds = array<i64: 1, 128>}, {pipeline_mode = #tpu.pipeline_mode<synchronous>, transform_indices = @transform_7, window_bounds = array<i64: 1, 128>}, {pipeline_mode = #tpu.pipeline_mode<synchronous>, transform_indices = @transform_8, window_bounds = array<i64: 1, 128>}, {transform_indices = @transform_9, window_bounds = array<i64: 64, 128>}]} {
    %c0 = arith.constant 0 : index
    %c0_0 = arith.constant 0 : index
    %0 = vector.load %arg1[%c0, %c0_0] : memref<64x32xf32, #tpu.memory_space<vmem>>, vector<64x32xf32>
    %c0_1 = arith.constant 0 : index
    %c0_2 = arith.constant 0 : index
    %1 = vector.load %arg2[%c0_1, %c0_2] : memref<32x128xf32, #tpu.memory_space<vmem>>, vector<32x128xf32>
    %cst = arith.constant dense<0.000000e+00> : vector<64x128xf32>
    %2 = tpu.matmul %0, %1, %cst {dimension_numbers = #tpu.dot_dimension_numbers<[1], [0], [0], [1], [0, 0, 1, 1], [], []>} : vector<64x32xf32>, vector<32x128xf32>, vector<64x128xf32> -> vector<64x128xf32>
    %c0_3 = arith.constant 0 : index
    %c0_4 = arith.constant 0 : index
    %3 = vector.load %arg3[%c0_3, %c0_4] : memref<1x128xf32, #tpu.memory_space<vmem>>, vector<1x128xf32>
    %4 = vector.broadcast %3 : vector<1x128xf32> to vector<64x128xf32>
    %5 = arith.addf %2, %4 : vector<64x128xf32>
    %cst_5 = arith.constant 0.000000e+00 : f32
    %6 = vector.broadcast %cst_5 : f32 to vector<64x96xf32>
    %7 = tpu.concatenate %0, %6 in 1 : vector<64x32xf32>, vector<64x96xf32> -> vector<64x128xf32>
    %c0_6 = arith.constant 0 : index
    %c0_7 = arith.constant 0 : index
    %8 = vector.load %arg4[%c0_6, %c0_7] : memref<1x128xf32, #tpu.memory_space<vmem>>, vector<1x128xf32>
    %c0_8 = arith.constant 0 : index
    %c0_9 = arith.constant 0 : index
    %9 = vector.load %arg5[%c0_8, %c0_9] : memref<1x128xf32, #tpu.memory_space<vmem>>, vector<1x128xf32>
    %cst_10 = arith.constant dense<0.000000e+00> : vector<64xf32>
    %10 = vector.multi_reduction <add>, %5, %cst_10 [1] : vector<64x128xf32> to vector<64xf32>
    %11 = vector.shape_cast %10 : vector<64xf32> to vector<64x1xf32>
    %cst_11 = arith.constant 1.562500e-02 : f32
    %12 = vector.broadcast %cst_11 : f32 to vector<64x1xf32>
    %13 = arith.mulf %11, %12 : vector<64x1xf32>
    %14 = vector.broadcast %13 : vector<64x1xf32> to vector<64x128xf32>
    %15 = arith.subf %5, %14 : vector<64x128xf32>
    %16 = arith.mulf %15, %15 : vector<64x128xf32>
    %cst_12 = arith.constant dense<0.000000e+00> : vector<64xf32>
    %17 = vector.multi_reduction <add>, %16, %cst_12 [1] : vector<64x128xf32> to vector<64xf32>
    %18 = vector.shape_cast %17 : vector<64xf32> to vector<64x1xf32>
    %19 = arith.mulf %13, %13 : vector<64x1xf32>
    %cst_13 = arith.constant 6.400000e+01 : f32
    %20 = vector.broadcast %cst_13 : f32 to vector<64x1xf32>
    %21 = arith.mulf %20, %19 : vector<64x1xf32>
    %22 = arith.subf %18, %21 : vector<64x1xf32>
    %cst_14 = arith.constant 1.562500e-02 : f32
    %23 = vector.broadcast %cst_14 : f32 to vector<64x1xf32>
    %24 = arith.mulf %22, %23 : vector<64x1xf32>
    %cst_15 = arith.constant 9.99999974E-6 : f32
    %25 = vector.broadcast %cst_15 : f32 to vector<64x1xf32>
    %26 = arith.addf %24, %25 : vector<64x1xf32>
    %27 = math.rsqrt %26 : vector<64x1xf32>
    %28 = vector.broadcast %27 : vector<64x1xf32> to vector<64x128xf32>
    %29 = arith.mulf %15, %28 : vector<64x128xf32>
    %30 = vector.broadcast %8 : vector<1x128xf32> to vector<64x128xf32>
    %31 = arith.mulf %29, %30 : vector<64x128xf32>
    %32 = vector.broadcast %9 : vector<1x128xf32> to vector<64x128xf32>
    %33 = arith.addf %31, %32 : vector<64x128xf32>
    %cst_16 = arith.constant 0.000000e+00 : f32
    %34 = vector.broadcast %cst_16 : f32 to vector<64x128xf32>
    %35 = arith.maximumf %33, %34 : vector<64x128xf32>
    %c0_17 = arith.constant 0 : index
    %c0_18 = arith.constant 0 : index
    %36 = vector.load %arg6[%c0_17, %c0_18] : memref<128x128xf32, #tpu.memory_space<vmem>>, vector<128x128xf32>
    %cst_19 = arith.constant dense<0.000000e+00> : vector<64x128xf32>
    %37 = tpu.matmul %35, %36, %cst_19 {dimension_numbers = #tpu.dot_dimension_numbers<[1], [0], [0], [1], [0, 0, 1, 1], [], []>} : vector<64x128xf32>, vector<128x128xf32>, vector<64x128xf32> -> vector<64x128xf32>
    %c0_20 = arith.constant 0 : index
    %c0_21 = arith.constant 0 : index
    %38 = vector.load %arg7[%c0_20, %c0_21] : memref<1x128xf32, #tpu.memory_space<vmem>>, vector<1x128xf32>
    %39 = vector.broadcast %38 : vector<1x128xf32> to vector<64x128xf32>
    %40 = arith.addf %37, %39 : vector<64x128xf32>
    %c0_22 = arith.constant 0 : index
    %c0_23 = arith.constant 0 : index
    %41 = vector.load %arg8[%c0_22, %c0_23] : memref<1x128xf32, #tpu.memory_space<vmem>>, vector<1x128xf32>
    %c0_24 = arith.constant 0 : index
    %c0_25 = arith.constant 0 : index
    %42 = vector.load %arg9[%c0_24, %c0_25] : memref<1x128xf32, #tpu.memory_space<vmem>>, vector<1x128xf32>
    %cst_26 = arith.constant dense<0.000000e+00> : vector<64xf32>
    %43 = vector.multi_reduction <add>, %40, %cst_26 [1] : vector<64x128xf32> to vector<64xf32>
    %44 = vector.shape_cast %43 : vector<64xf32> to vector<64x1xf32>
    %cst_27 = arith.constant 3.125000e-02 : f32
    %45 = vector.broadcast %cst_27 : f32 to vector<64x1xf32>
    %46 = arith.mulf %44, %45 : vector<64x1xf32>
    %47 = vector.broadcast %46 : vector<64x1xf32> to vector<64x128xf32>
    %48 = arith.subf %40, %47 : vector<64x128xf32>
    %49 = arith.mulf %48, %48 : vector<64x128xf32>
    %cst_28 = arith.constant dense<0.000000e+00> : vector<64xf32>
    %50 = vector.multi_reduction <add>, %49, %cst_28 [1] : vector<64x128xf32> to vector<64xf32>
    %51 = vector.shape_cast %50 : vector<64xf32> to vector<64x1xf32>
    %52 = arith.mulf %46, %46 : vector<64x1xf32>
    %cst_29 = arith.constant 9.600000e+01 : f32
    %53 = vector.broadcast %cst_29 : f32 to vector<64x1xf32>
    %54 = arith.mulf %53, %52 : vector<64x1xf32>
    %55 = arith.subf %51, %54 : vector<64x1xf32>
    %cst_30 = arith.constant 3.125000e-02 : f32
    %56 = vector.broadcast %cst_30 : f32 to vector<64x1xf32>
    %57 = arith.mulf %55, %56 : vector<64x1xf32>
    %cst_31 = arith.constant 9.99999974E-6 : f32
    %58 = vector.broadcast %cst_31 : f32 to vector<64x1xf32>
    %59 = arith.addf %57, %58 : vector<64x1xf32>
    %60 = math.rsqrt %59 : vector<64x1xf32>
    %61 = vector.broadcast %60 : vector<64x1xf32> to vector<64x128xf32>
    %62 = arith.mulf %48, %61 : vector<64x128xf32>
    %63 = vector.broadcast %41 : vector<1x128xf32> to vector<64x128xf32>
    %64 = arith.mulf %62, %63 : vector<64x128xf32>
    %65 = vector.broadcast %42 : vector<1x128xf32> to vector<64x128xf32>
    %66 = arith.addf %64, %65 : vector<64x128xf32>
    %67 = arith.addf %66, %7 : vector<64x128xf32>
    %cst_32 = arith.constant 0.000000e+00 : f32
    %68 = vector.broadcast %cst_32 : f32 to vector<64x128xf32>
    %69 = arith.maximumf %67, %68 : vector<64x128xf32>
    %c0_33 = arith.constant 0 : index
    %c0_34 = arith.constant 0 : index
    %70 = vector.load %arg10[%c0_33, %c0_34] : memref<64x128xf32, #tpu.memory_space<vmem>>, vector<64x128xf32>
    tpu.vector_store %arg10[%c0_33, %c0_34], %69 {strides = array<i32>} : memref<64x128xf32, #tpu.memory_space<vmem>>, vector<64x128xf32>,
    return
  }
  func.func @transform_0(%arg0: i32) -> (i32, i32) {
    %c0_i32 = arith.constant 0 : i32
    %c0_i32_0 = arith.constant 0 : i32
    return %arg0, %c0_i32 : i32, i32
  }
  func.func @transform_1(%arg0: i32) -> (i32, i32) {
    %c0_i32 = arith.constant 0 : i32
    %c0_i32_0 = arith.constant 0 : i32
    %c0_i32_1 = arith.constant 0 : i32
    return %c0_i32, %c0_i32_0 : i32, i32
  }
  func.func @transform_2(%arg0: i32) -> (i32, i32) {
    %c0_i32 = arith.constant 0 : i32
    %c0_i32_0 = arith.constant 0 : i32
    %c0_i32_1 = arith.constant 0 : i32
    return %c0_i32, %c0_i32_0 : i32, i32
  }
  func.func @transform_3(%arg0: i32) -> (i32, i32) {
    %c0_i32 = arith.constant 0 : i32
    %c0_i32_0 = arith.constant 0 : i32
    %c0_i32_1 = arith.constant 0 : i32
    return %c0_i32, %c0_i32_0 : i32, i32
  }
  func.func @transform_4(%arg0: i32) -> (i32, i32) {
    %c0_i32 = arith.constant 0 : i32
    %c0_i32_0 = arith.constant 0 : i32
    %c0_i32_1 = arith.constant 0 : i32
    return %c0_i32, %c0_i32_0 : i32, i32
  }
  func.func @transform_5(%arg0: i32) -> (i32, i32) {
    %c0_i32 = arith.constant 0 : i32
    %c0_i32_0 = arith.constant 0 : i32
    %c0_i32_1 = arith.constant 0 : i32
    return %c0_i32, %c0_i32_0 : i32, i32
  }
  func.func @transform_6(%arg0: i32) -> (i32, i32) {
    %c0_i32 = arith.constant 0 : i32
    %c0_i32_0 = arith.constant 0 : i32
    %c0_i32_1 = arith.constant 0 : i32
    return %c0_i32, %c0_i32_0 : i32, i32
  }
  func.func @transform_7(%arg0: i32) -> (i32, i32) {
    %c0_i32 = arith.constant 0 : i32
    %c0_i32_0 = arith.constant 0 : i32
    %c0_i32_1 = arith.constant 0 : i32
    return %c0_i32, %c0_i32_0 : i32, i32
  }
  func.func @transform_8(%arg0: i32) -> (i32, i32) {
    %c0_i32 = arith.constant 0 : i32
    %c0_i32_0 = arith.constant 0 : i32
    %c0_i32_1 = arith.constant 0 : i32
    return %c0_i32, %c0_i32_0 : i32, i32
  }
  func.func @transform_9(%arg0: i32) -> (i32, i32) {
    %c0_i32 = arith.constant 0 : i32
    %c0_i32_0 = arith.constant 0 : i32
    return %arg0, %c0_i32 : i32, i32
  }
}

</mosaic_0001>

<bundles_post_ra>
// kernel: tpu_custom_call.1
= control target key start
LH: loop header
LB: loop body
LE: loop exit
PB: predicated region body
PF: predicated region fallthrough
CT: control target
= control target key end

     0   :  { %14 = vsyncpa [#allocation3], 0  ;;  %s1224_s0 = inlined_call_operand.vmem [shape: f32[64,32], index: 0, kind: input, shape index: {}]   ;;  %s1225_s1 = inlined_call_operand.vmem [shape: f32[32,128], index: 1, kind: input, shape index: {}]   ;;  %s1226_s2 = inlined_call_operand.vmem [shape: f32[1,128], index: 2, kind: input, shape index: {}]   ;;  %s1227_s3 = inlined_call_operand.vmem [shape: f32[1,128], index: 3, kind: input, shape index: {}]   ;;  %s1228_s4 = inlined_call_operand.vmem [shape: f32[1,128], index: 4, kind: input, shape index: {}]   ;;  %s1229_s5 = inlined_call_operand.hbm [shape: f32[128,128], index: 5, kind: input, shape index: {}]   ;;  %s1230_s6 = inlined_call_operand.vmem [shape: f32[1,128], index: 6, kind: input, shape index: {}]   ;;  %s1231_s7 = inlined_call_operand.vmem [shape: f32[1,128], index: 7, kind: input, shape index: {}]   ;;  %s1232_s8 = inlined_call_operand.vmem [shape: f32[1,128], index: 8, kind: input, shape index: {}]   ;;  %s1233_s9 = inlined_call_operand.hbm [shape: f32[64,128], index: 9, kind: output, shape index: {}]  }
   0x1   :  { %15 = vsyncpa [#allocation4], 0  ;;  %s30_s11 = sshll.u32 %s1229_s5, 4  ;;  %s805_s12 = smov [#allocation2]   ;;  %s31_s11 = int_to_ptr.hbm [resolvable:$true] %s30_s11 }
   0x2   :  { %s32_s13 = sshll.u32 %s805_s12, 4  ;;  %s806_s14 = smov 128   ;;  %s33_s13 = int_to_ptr.vmem [resolvable:$true] %s32_s13 }
   0x3   :  { %s807_s15 = smov 8  }
   0x4   :  { %38 = dma.hbm_to_vmem [thread:$0]  %s31_s11, 2048, %s33_s13, [#allocation3], %s806_s14, %s806_s14, %s807_s15  }
   0x5   :  { %801 = dma.done.wait [#allocation3], 2048  }
   0x6   :  { %802 = vsyncadd [#allocation3], 4294965248  ;;  %v60_v0 = vld [vmem:[%s1225_s1 + $0x18] sm:$0xff]  ;;  %v59_v1 = vld [vmem:[%s1225_s1 + $0x10] sm:$0xff]  ;;  %vm65_vm0 = vcmask 261120   ;;  %s654_s27 = sshll.u32 %s1233_s9, 4  ;;  %s655_s27 = int_to_ptr.hbm [resolvable:$true] %s654_s27 }
   0x7   :  { %102 = vmatpush.msra.mxu0 %v60_v0  ;;  %v58_v2 = vld [vmem:[%s1225_s1 + $0x8] sm:$0xff]  ;;  %v49_v3 = vld [vmem:[%s1224_s0] sm:$0xff]  ;;  %675 = vmatpush.msra.mxu3 %v60_v0  ;;  %v51_v7 = vld [vmem:[%s1224_s0 + $0x10] sm:$0xff] }
   0x8   :  { %v50_v4 = vld [vmem:[%s1224_s0 + $0x8] sm:$0xff]  ;;  %v881_v5 = vsel %vm65_vm0, %v49_v3, 0.0  ;;  %v52_v8 = vld [vmem:[%s1224_s0 + $0x18] sm:$0xff]  ;;  %v55_v9 = vld [vmem:[%s1224_s0 + $0x30] sm:$0xff]  ;;  %v899_v11 = vsel %vm65_vm0, %v51_v7, 0.0 }
   0x9   :  { %v884_v6 = vsel %vm65_vm0, %v50_v4, 0.0  ;;  %103 = vmatpush.msra.mxu0 %v59_v1  ;;  %v57_v10 = vld [vmem:[%s1225_s1] sm:$0xff]  ;;  %676 = vmatpush.msra.mxu3 %v59_v1  ;;  %v902_v12 = vsel %vm65_vm0, %v52_v8, 0.0  ;;  %v905_v13 = vsel %vm65_vm0, %v55_v9, 0.0  ;;  %v56_v16 = vld [vmem:[%s1224_s0 + $0x38] sm:$0xff]  ;;  %v54_v18 = vld [vmem:[%s1224_s0 + $0x28] sm:$0xff] }
   0xa   :  { %v53_v14 = vld [vmem:[%s1224_s0 + $0x20] sm:$0xff]  ;;  %v919_v17 = vsel %vm65_vm0, %v56_v16, 0.0  ;;  %v927_v19 = vsel %vm65_vm0, %v54_v18, 0.0 }
   0xb   :  { %104 = vmatpush.msra.mxu0 %v58_v2  ;;  %677 = vmatpush.msra.mxu3 %v58_v2  ;;  %v913_v15 = vsel %vm65_vm0, %v53_v14, 0.0  ;;  %v715_v21 = vld [vmem:[%s1226_s2] ss:$0 sm:$0xff] }
   0xd   :  { %105 = vmatpush.msra.mxu0 %v57_v10  ;;  %678 = vmatpush.msra.mxu3 %v57_v10  ;;  %v367_v10 = vld [vmem:[#allocation2 + $0x60] sm:$0xff] }
   0xe   :  { %667 = vmatmul.msk.f32.vlgmr.msra.gmra.mxu0 %vm65_vm0, %v49_v3  ;;  %673 = vmatmul.msk.f32.vlgmr.msra.gmra.mxu3 %vm65_vm0, %v55_v9  ;;  %v368_v9 = vld [vmem:[#allocation2 + $0x68] sm:$0xff] }
  0x16   :  { %668 = vmatmul.msk.f32.gmra.mxu0 %vm65_vm0, %v50_v4  ;;  %674 = vmatmul.msk.f32.gmra.mxu3 %vm65_vm0, %v56_v16  ;;  %v365_v16 = vld [vmem:[#allocation2 + $0x50] sm:$0xff] }
  0x1e   :  { %669 = vmatmul.msk.f32.gmra.mxu0 %vm65_vm0, %v51_v7  ;;  %v370_v7 = vld [vmem:[#allocation2 + $0x78] sm:$0xff] }
  0x1f   :  { %679 = vmatpush.msra.mxu2 %v370_v7  ;;  %375 = vmatpush.msra.mxu1 %v370_v7 }
  0x20   :  { %680 = vmatpush.msrb.mxu3 %v370_v7 }
  0x26   :  { %670 = vmatmul.msk.f32.gmra.mxu0 %vm65_vm0, %v52_v8  ;;  %v369_v8 = vld [vmem:[#allocation2 + $0x70] sm:$0xff] }
  0x27   :  { %681 = vmatpush.msra.mxu2 %v369_v8  ;;  %376 = vmatpush.msra.mxu1 %v369_v8 }
  0x28   :  { %682 = vmatpush.msrb.mxu3 %v369_v8 }
  0x29   :  { %683 = vmatpush.msra.mxu2 %v368_v9  ;;  %377 = vmatpush.msra.mxu1 %v368_v9 }
  0x2a   :  { %684 = vmatpush.msrb.mxu3 %v368_v9 }
  0x2b   :  { %685 = vmatpush.msra.mxu2 %v367_v10  ;;  %378 = vmatpush.msra.mxu1 %v367_v10 }
  0x2c   :  { %686 = vmatpush.msrb.mxu3 %v367_v10 }
  0x2e   :  { %671 = vmatmul.msk.f32.gmra.mxu0 %vm65_vm0, %v53_v14  ;;  %v366_v14 = vld [vmem:[#allocation2 + $0x58] sm:$0xff] }
  0x2f   :  { %687 = vmatpush.msra.mxu2 %v366_v14  ;;  %379 = vmatpush.msra.mxu1 %v366_v14 }
  0x30   :  { %688 = vmatpush.msrb.mxu3 %v366_v14 }
  0x31   :  { %689 = vmatpush.msra.mxu2 %v365_v16  ;;  %380 = vmatpush.msra.mxu1 %v365_v16 }
  0x32   :  { %690 = vmatpush.msrb.mxu3 %v365_v16 }
  0x36   :  { %672 = vmatmul.msk.f32.gmra.mxu0 %vm65_vm0, %v54_v18  ;;  %v364_v18 = vld [vmem:[#allocation2 + $0x48] sm:$0xff] }
  0x37   :  { %691 = vmatpush.msra.mxu2 %v364_v18  ;;  %381 = vmatpush.msra.mxu1 %v364_v18 }
  0x38   :  { %692 = vmatpush.msrb.mxu3 %v364_v18 }
  0x8b   :  { %v107_v20 = vpop.f32.mrf.mxu0 }
  0x8c   :  { %v108_v29 = vadd.f32 %v715_v21, %v107_v20  ;;  %v363_v20 = vld [vmem:[#allocation2 + $0x40] sm:$0xff] }
  0x8d   :  { %693 = vmatpush.msra.mxu2 %v363_v20  ;;  %382 = vmatpush.msra.mxu1 %v363_v20 }
  0x8e   :  { %694 = vmatpush.msrb.mxu3 %v363_v20 }
  0x91   :  { %v125_v27 = vpop.f32.mrf.mxu3 }
  0x92   :  { %v126_v32 = vadd.f32 %v715_v21, %v125_v27  ;;  %v357_v27 = vld [vmem:[#allocation2 + $0x10] sm:$0xff] }
  0x93   :  { %v110_v22 = vpop.f32.mrf.mxu0 }
  0x94   :  { %v111_v23 = vadd.f32 %v715_v21, %v110_v22  ;;  %v361_v22 = vld [vmem:[#allocation2 + $0x30] sm:$0xff] }
  0x96   :  { %143 = vadd.xlane.f32.xlu2 %v111_v23 }
  0x99   :  { %v128_v31 = vpop.f32.mrf.mxu3 }
  0x9a   :  { %v129_v34 = vadd.f32 %v715_v21, %v128_v31 }
  0x9b   :  { %v113_v24 = vpop.f32.mrf.mxu0 }
  0x9c   :  { %v114_v36 = vadd.f32 %v715_v21, %v113_v24  ;;  %v359_v24 = vld [vmem:[#allocation2 + $0x20] sm:$0xff] }
  0xa3   :  { %v116_v25 = vpop.f32.mrf.mxu0 }
  0xa4   :  { %v117_v26 = vadd.f32 %v715_v21, %v116_v25 }
  0xa6   :  { %147 = vadd.xlane.f32.xlu0 %v117_v26 }
  0xab   :  { %v119_v28 = vpop.f32.mrf.mxu0 }
  0xac   :  { %v120_v30 = vadd.f32 %v715_v21, %v119_v28 }
  0xae   :  { %149 = vadd.xlane.f32.xlu1 %v120_v30  ;;  %141 = vadd.xlane.f32.xlu0 %v108_v29 }
  0xb3   :  { %v122_v33 = vpop.f32.mrf.mxu0 }
  0xb4   :  { %v123_v35 = vadd.f32 %v715_v21, %v122_v33  ;;  %v362_v21 = vld [vmem:[#allocation2 + $0x38] sm:$0xff] }
  0xb5   :  { %695 = vmatpush.msra.mxu2 %v362_v21  ;;  %383 = vmatpush.msra.mxu1 %v362_v21 }
  0xb6   :  { %153 = vadd.xlane.f32.xlu1 %v126_v32  ;;  %151 = vadd.xlane.f32.xlu2 %v123_v35 }
  0xb7   :  { %155 = vadd.xlane.f32.xlu0 %v129_v34  ;;  %696 = vmatpush.msrb.mxu3 %v362_v21 }
  0xb8   :  { %697 = vmatpush.msra.mxu2 %v361_v22  ;;  %384 = vmatpush.msra.mxu1 %v361_v22 }
  0xb9   :  { %698 = vmatpush.msrb.mxu3 %v361_v22 }
  0xbe   :  { %145 = vadd.xlane.f32.xlu1 %v114_v36 }
 0x109   :  { %v144_v41 = vpop.xlane.xlu2 %143 }
 0x10a   :  { %v957_v50 = vmul.f32 0.015625, %v144_v41 }
 0x10c   :  { %v964_v55 = vsub.f32 %v111_v23, %v957_v50  ;;  %v360_v23 = vld [vmem:[#allocation2 + $0x28] sm:$0xff] }
 0x10d   :  { %699 = vmatpush.msra.mxu2 %v360_v23  ;;  %385 = vmatpush.msra.mxu1 %v360_v23 }
 0x10e   :  { %v174_v62 = vmul.f32 %v964_v55, %v964_v55  ;;  %700 = vmatpush.msrb.mxu3 %v360_v23 }
 0x10f   :  { %701 = vmatpush.msra.mxu2 %v359_v24  ;;  %386 = vmatpush.msra.mxu1 %v359_v24 }
 0x110   :  { %702 = vmatpush.msrb.mxu3 %v359_v24 }
 0x119   :  { %v148_v37 = vpop.xlane.xlu0 %147 }
 0x11a   :  { %v936_v38 = vmul.f32 0.015625, %v148_v37 }
 0x11c   :  { %v939_v39 = vsub.f32 %v117_v26, %v936_v38  ;;  %v200_v25 = vmul.f32 %v936_v38, %v936_v38  ;;  %v358_v26 = vld [vmem:[#allocation2 + $0x18] sm:$0xff] }
 0x11d   :  { %703 = vmatpush.msra.mxu2 %v358_v26  ;;  %387 = vmatpush.msra.mxu1 %v358_v26 }
 0x11e   :  { %v176_v40 = vmul.f32 %v939_v39, %v939_v39  ;;  %704 = vmatpush.msrb.mxu3 %v358_v26  ;;  %v208_v28 = vmul.f32 64.0, %v200_v25 }
 0x11f   :  { %705 = vmatpush.msra.mxu2 %v357_v27  ;;  %388 = vmatpush.msra.mxu1 %v357_v27 }
 0x120   :  { %187 = vadd.xlane.f32.xlu2 %v176_v40  ;;  %706 = vmatpush.msrb.mxu3 %v357_v27 }
 0x121   :  { %v150_v42 = vpop.xlane.xlu1 %149  ;;  %v142_v43 = vpop.xlane.xlu0 %141 }
 0x122   :  { %v943_v44 = vmul.f32 0.015625, %v150_v42  ;;  %v945_v45 = vmul.f32 0.015625, %v142_v43 }
 0x124   :  { %v948_v46 = vsub.f32 %v120_v30, %v943_v44  ;;  %v951_v47 = vsub.f32 %v108_v29, %v945_v45  ;;  %v356_v29 = vld [vmem:[#allocation2 + $0x8] sm:$0xff]  ;;  %v201_v33 = vmul.f32 %v943_v44, %v943_v44 }
 0x125   :  { %707 = vmatpush.msra.mxu2 %v356_v29  ;;  %389 = vmatpush.msra.mxu1 %v356_v29 }
 0x126   :  { %v177_v48 = vmul.f32 %v948_v46, %v948_v46  ;;  %v173_v49 = vmul.f32 %v951_v47, %v951_v47  ;;  %708 = vmatpush.msrb.mxu3 %v356_v29  ;;  %v209_v37 = vmul.f32 64.0, %v201_v33 }
 0x128   :  { %189 = vadd.xlane.f32.xlu1 %v177_v48  ;;  %181 = vadd.xlane.f32.xlu0 %v173_v49 }
 0x129   :  { %v154_v51 = vpop.xlane.xlu1 %153  ;;  %v152_v52 = vpop.xlane.xlu2 %151 }
 0x12a   :  { %v959_v53 = vmul.f32 0.015625, %v154_v51  ;;  %v961_v54 = vmul.f32 0.015625, %v152_v52  ;;  %v156_v56 = vpop.xlane.xlu0 %155 }
 0x12b   :  { %v972_v59 = vmul.f32 0.015625, %v156_v56 }
 0x12c   :  { %v967_v57 = vsub.f32 %v126_v32, %v959_v53  ;;  %v970_v58 = vsub.f32 %v123_v35, %v961_v54  ;;  %v355_v32 = vld [vmem:[#allocation2] sm:$0xff]  ;;  %v203_v48 = vmul.f32 %v959_v53, %v959_v53  ;;  %v202_v49 = vmul.f32 %v961_v54, %v961_v54 }
 0x12d   :  { %v981_v0 = vsub.f32 %v129_v34, %v972_v59  ;;  %709 = vmatpush.msra.mxu2 %v355_v32  ;;  %390 = vmatpush.msra.mxu1 %v355_v32  ;;  %v197_v34 = vmul.f32 %v945_v45, %v945_v45  ;;  %v198_v45 = vmul.f32 %v957_v50, %v957_v50 }
 0x12e   :  { %v179_v60 = vmul.f32 %v967_v57, %v967_v57  ;;  %v178_v61 = vmul.f32 %v970_v58, %v970_v58  ;;  %710 = vmatpush.msrb.mxu3 %v355_v32  ;;  %v204_v14 = vmul.f32 %v972_v59, %v972_v59 }
 0x12f   :  { %v180_v4 = vmul.f32 %v981_v0, %v981_v0  ;;  %v205_v38 = vmul.f32 64.0, %v197_v34 }
 0x130   :  { %193 = vadd.xlane.f32.xlu2 %v179_v60  ;;  %191 = vadd.xlane.f32.xlu1 %v178_v61 }
 0x131   :  { %183 = vadd.xlane.f32.xlu0 %v174_v62  ;;  %v146_v63 = vpop.xlane.xlu1 %145  ;;  %v210_v62 = vmul.f32 64.0, %v202_v49 }
 0x132   :  { %v983_v1 = vmul.f32 0.015625, %v146_v63  ;;  %v211_v63 = vmul.f32 64.0, %v203_v48 }
 0x134   :  { %v986_v2 = vsub.f32 %v114_v36, %v983_v1  ;;  %v199_v20 = vmul.f32 %v983_v1, %v983_v1  ;;  %v212_v1 = vmul.f32 64.0, %v204_v14 }
 0x136   :  { %v175_v3 = vmul.f32 %v986_v2, %v986_v2  ;;  %v207_v32 = vmul.f32 64.0, %v199_v20 }
 0x138   :  { %195 = vadd.xlane.f32.xlu2 %v180_v4  ;;  %v206_v4 = vmul.f32 64.0, %v198_v45 }
 0x139   :  { %185 = vadd.xlane.f32.xlu0 %v175_v3 }
 0x193   :  { %v188_v30 = vpop.xlane.xlu2 %187 }
 0x194   :  { %v216_v31 = vsub.f32 %v188_v30, %v208_v28 }
 0x196   :  { %v224_v35 = vmul.f32 0.015625, %v216_v31 }
 0x198   :  { %v232_v36 = vadd.f32 1e-05, %v224_v35 }
 0x19a   :  { %721 = vrsqrt.f32 %v232_v36  ;;  %vm273_vm2 = vweird.f32 %v232_v36 }
 0x19b   :  { %v190_v40 = vpop.xlane.xlu1 %189  ;;  %v182_v41 = vpop.xlane.xlu0 %181 }
 0x19c   :  { %v217_v42 = vsub.f32 %v190_v40, %v209_v37  ;;  %v213_v43 = vsub.f32 %v182_v41, %v205_v38 }
 0x19e   :  { %v225_v44 = vmul.f32 0.015625, %v217_v42  ;;  %v221_v51 = vmul.f32 0.015625, %v213_v43 }
 0x1a0   :  { %v722_v52 = vpop.eup %721  ;;  %v1004_v56 = vadd.f32 1e-05, %v225_v44  ;;  %v1006_v60 = vadd.f32 1e-05, %v221_v51 }
 0x1a1   :  { %v268_v61 = vmul.f32 %v722_v52, %v232_v36  ;;  %vm274_vm1 = vweird.f32 %v722_v52  ;;  %v1028_v36 = vld [vmem:[%s1227_s3] ss:$0 sm:$0xff] }
 0x1a2   :  { %723 = vrsqrt.f32 %v1004_v56  ;;  %vm275_vm3 = vmor %vm273_vm2, %vm274_vm1  ;;  %vm283_vm6 = vweird.f32 %v1004_v56  ;;  %vm243_vm8 = vweird.f32 %v1006_v60 }
 0x1a3   :  { %v269_v3 = vmul.f32 %v722_v52, %v268_v61  ;;  %725 = vrsqrt.f32 %v1006_v60  ;;  %v192_v53 = vpop.xlane.xlu1 %191  ;;  %v194_v54 = vpop.xlane.xlu2 %193  ;;  %v1039_v61 = vld [vmem:[%s1228_s4] ss:$0 sm:$0xff] }
 0x1a4   :  { %v218_v7 = vsub.f32 %v192_v53, %v210_v62  ;;  %v219_v8 = vsub.f32 %v194_v54, %v211_v63  ;;  %v184_v9 = vpop.xlane.xlu0 %183 }
 0x1a5   :  { %v270_v50 = vmul.f32 0.5, %v269_v3  ;;  %v214_v10 = vsub.f32 %v184_v9, %v206_v4 }
 0x1a6   :  { %v226_v16 = vmul.f32 0.015625, %v218_v7  ;;  %v227_v18 = vmul.f32 0.015625, %v219_v8 }
 0x1a7   :  { %v271_v21 = vsub.f32 1.5, %v270_v50  ;;  %v222_v22 = vmul.f32 0.015625, %v214_v10 }
 0x1a8   :  { %v724_v23 = vpop.eup %723  ;;  %v1014_v24 = vadd.f32 1e-05, %v226_v16  ;;  %v1016_v25 = vadd.f32 1e-05, %v227_v18 }
 0x1a9   :  { %v726_v26 = vpop.eup %725  ;;  %v272_v27 = vmul.f32 %v722_v52, %v271_v21  ;;  %v278_v28 = vmul.f32 %v724_v23, %v1004_v56  ;;  %v1019_v29 = vadd.f32 1e-05, %v222_v22  ;;  %vm284_vm4 = vweird.f32 %v724_v23 }
 0x1aa   :  { %v238_v59 = vmul.f32 %v726_v26, %v1006_v60  ;;  %727 = vrsqrt.f32 %v1014_v24  ;;  %vm244_vm5 = vweird.f32 %v726_v26  ;;  %vm285_vm7 = vmor %vm283_vm6, %vm284_vm4  ;;  %vm293_vm10 = vweird.f32 %v1014_v24 }
 0x1ab   :  { %v279_v30 = vmul.f32 %v724_v23, %v278_v28  ;;  %729 = vrsqrt.f32 %v1016_v25  ;;  %v196_v31 = vpop.xlane.xlu2 %195  ;;  %v276_v37 = vsel %vm275_vm3, %v722_v52, %v272_v27  ;;  %vm245_vm9 = vmor %vm243_vm8, %vm244_vm5  ;;  %vm303_vm15 = vweird.f32 %v1016_v25 }
 0x1ac   :  { %v239_v33 = vmul.f32 %v726_v26, %v238_v59  ;;  %731 = vrsqrt.f32 %v1019_v29  ;;  %v220_v34 = vsub.f32 %v196_v31, %v212_v1  ;;  %v186_v35 = vpop.xlane.xlu0 %185  ;;  %v320_v41 = vmul.f32 %v276_v37, %v939_v39 }
 0x1ad   :  { %v280_v38 = vmul.f32 0.5, %v279_v30  ;;  %v215_v40 = vsub.f32 %v186_v35, %v207_v32  ;;  %vm253_vm1 = vweird.f32 %v1019_v29 }
 0x1ae   :  { %v240_v42 = vmul.f32 0.5, %v239_v33  ;;  %v228_v43 = vmul.f32 0.015625, %v220_v34  ;;  %v331_v52 = vmul.f32 %v1028_v36, %v320_v41 }
 0x1af   :  { %v281_v48 = vsub.f32 1.5, %v280_v38  ;;  %v223_v49 = vmul.f32 0.015625, %v215_v40 }
 0x1b0   :  { %v1031_v44 = vpop.eup %727  ;;  %v241_v51 = vsub.f32 1.5, %v240_v42  ;;  %v1033_v45 = vadd.f32 1e-05, %v228_v43  ;;  %v342_v56 = vadd.f32 %v1039_v61, %v331_v52 }
 0x1b1   :  { %v1041_v62 = vpop.eup %729  ;;  %v282_v39 = vmul.f32 %v724_v23, %v281_v48  ;;  %v288_v63 = vmul.f32 %v1031_v44, %v1014_v24  ;;  %v1045_v3 = vadd.f32 1e-05, %v223_v49  ;;  %vm294_vm11 = vweird.f32 %v1031_v44 }
 0x1b2   :  { %v732_v53 = vpop.eup %731  ;;  %v242_v54 = vmul.f32 %v726_v26, %v241_v51  ;;  %v298_v4 = vmul.f32 %v1041_v62, %v1016_v25  ;;  %733 = vrsqrt.f32 %v1033_v45  ;;  %v350_v20 = vmax.f32 %v342_v56, 0.0  ;;  %vm1067_vm14 = vmor %vm293_vm10, %vm294_vm11 }
 0x1b3   :  { %v289_v7 = vmul.f32 %v1031_v44, %v288_v63  ;;  %v248_v8 = vmul.f32 %v732_v53, %v1019_v29  ;;  %735 = vrsqrt.f32 %v1045_v3  ;;  %v286_v16 = vsel %vm285_vm7, %v724_v23, %v282_v39 }
 0x1b4   :  { %v299_v9 = vmul.f32 %v1041_v62, %v298_v4  ;;  %v246_v14 = vsel %vm245_vm9, %v726_v26, %v242_v54  ;;  %v321_v60 = vmul.f32 %v286_v16, %v948_v46  ;;  %vm304_vm12 = vweird.f32 %v1041_v62  ;;  %400 = vmatmul.f32.vlgmr.msra.gmra.mxu2 %v350_v20 }
 0x1b5   :  { %v290_v50 = vmul.f32 0.5, %v289_v7  ;;  %v249_v10 = vmul.f32 %v732_v53, %v248_v8  ;;  %v317_v21 = vmul.f32 %v246_v14, %v951_v47  ;;  %vm254_vm13 = vweird.f32 %v732_v53  ;;  %vm1075_vm0 = vmor %vm303_vm15, %vm304_vm12 }
 0x1b6   :  { %v300_v18 = vmul.f32 0.5, %v299_v9  ;;  %v332_v23 = vmul.f32 %v1028_v36, %v321_v60  ;;  %vm255_vm2 = vmor %vm253_vm1, %vm254_vm13  ;;  %vm313_vm4 = vweird.f32 %v1033_v45  ;;  %vm263_vm7 = vweird.f32 %v1045_v3 }
 0x1b7   :  { %v291_v22 = vsub.f32 1.5, %v290_v50  ;;  %v250_v27 = vmul.f32 0.5, %v249_v10  ;;  %v328_v26 = vmul.f32 %v1028_v36, %v317_v21 }
 0x1b8   :  { %v734_v28 = vpop.eup %733  ;;  %v301_v59 = vsub.f32 1.5, %v300_v18  ;;  %v343_v33 = vadd.f32 %v1039_v61, %v332_v23 }
 0x1b9   :  { %v292_v1 = vmul.f32 %v1031_v44, %v291_v22  ;;  %v251_v47 = vsub.f32 1.5, %v250_v27  ;;  %v308_v46 = vmul.f32 %v734_v28, %v1033_v45  ;;  %v736_v30 = vpop.eup %735  ;;  %v339_v32 = vadd.f32 %v1039_v61, %v328_v26 }
 0x1ba   :  { %v302_v31 = vmul.f32 %v1041_v62, %v301_v59  ;;  %v258_v38 = vmul.f32 %v736_v30, %v1045_v3  ;;  %v351_v41 = vmax.f32 %v343_v33, 0.0  ;;  %vm314_vm3 = vweird.f32 %v734_v28 }
 0x1bb   :  { %v252_v35 = vmul.f32 %v732_v53, %v251_v47  ;;  %v309_v37 = vmul.f32 %v734_v28, %v308_v46  ;;  %v347_v25 = vmax.f32 %v339_v32, 0.0  ;;  %v296_v42 = vsel %vm1067_vm14, %v1031_v44, %v292_v1  ;;  %vm315_vm6 = vmor %vm313_vm4, %vm314_vm3 }
 0x1bc   :  { %v306_v40 = vsel %vm1075_vm0, %v1041_v62, %v302_v31  ;;  %v259_v48 = vmul.f32 %v736_v30, %v258_v38  ;;  %v322_v51 = vmul.f32 %v296_v42, %v970_v58  ;;  %403 = vmatmul.f32.gmra.mxu2 %v351_v41  ;;  %vm264_vm5 = vweird.f32 %v736_v30 }
 0x1bd   :  { %v310_v43 = vmul.f32 0.5, %v309_v37  ;;  %v256_v49 = vsel %vm255_vm2, %v732_v53, %v252_v35  ;;  %391 = vmatmul.f32.vlgmr.msra.gmra.mxu1 %v347_v25  ;;  %v323_v52 = vmul.f32 %v306_v40, %v967_v57  ;;  %vm265_vm8 = vmor %vm263_vm7, %vm264_vm5 }
 0x1be   :  { %v318_v29 = vmul.f32 %v256_v49, %v964_v55  ;;  %v260_v62 = vmul.f32 0.5, %v259_v48  ;;  %v333_v63 = vmul.f32 %v1028_v36, %v322_v51 }
 0x1bf   :  { %v311_v39 = vsub.f32 1.5, %v310_v43  ;;  %v334_v54 = vmul.f32 %v1028_v36, %v323_v52 }
 0x1c0   :  { %v329_v44 = vmul.f32 %v1028_v36, %v318_v29  ;;  %v261_v4 = vsub.f32 1.5, %v260_v62  ;;  %v344_v58 = vadd.f32 %v1039_v61, %v333_v63 }
 0x1c1   :  { %v312_v53 = vmul.f32 %v734_v28, %v311_v39  ;;  %v345_v57 = vadd.f32 %v1039_v61, %v334_v54 }
 0x1c2   :  { %v340_v55 = vadd.f32 %v1039_v61, %v329_v44  ;;  %v262_v7 = vmul.f32 %v736_v30, %v261_v4  ;;  %v352_v9 = vmax.f32 %v344_v58, 0.0 }
 0x1c3   :  { %v316_v8 = vsel %vm315_vm6, %v734_v28, %v312_v53  ;;  %v353_v56 = vmax.f32 %v345_v57, 0.0 }
 0x1c4   :  { %v348_v45 = vmax.f32 %v340_v55, 0.0  ;;  %v324_v50 = vmul.f32 %v316_v8, %v981_v0  ;;  %v266_v10 = vsel %vm265_vm8, %v736_v30, %v262_v7  ;;  %406 = vmatmul.f32.gmra.mxu2 %v352_v9  ;;  %v718_v0 = vld [vmem:[%s1230_s6] ss:$0 sm:$0xff] }
 0x1c5   :  { %409 = vmatmul.f32.vlgmr.msrb.gmra.mxu3 %v353_v56  ;;  %v319_v14 = vmul.f32 %v266_v10, %v986_v2 }
 0x1c6   :  { %394 = vmatmul.f32.gmra.mxu1 %v348_v45  ;;  %v335_v16 = vmul.f32 %v1028_v36, %v324_v50 }
 0x1c7   :  { %v330_v18 = vmul.f32 %v1028_v36, %v319_v14 }
 0x1c8   :  { %v346_v20 = vadd.f32 %v1039_v61, %v335_v16 }
 0x1c9   :  { %v341_v3 = vadd.f32 %v1039_v61, %v330_v18 }
 0x1ca   :  { %v354_v21 = vmax.f32 %v346_v20, 0.0 }
 0x1cb   :  { %v349_v60 = vmax.f32 %v341_v3, 0.0 }
 0x1cd   :  { %412 = vmatmul.f32.gmra.mxu3 %v354_v21 }
 0x1ce   :  { %397 = vmatmul.f32.gmra.mxu1 %v349_v60 }
 0x237   :  { %v401_v2 = vpop.f32.mrf.mxu2 }
 0x238   :  { %v402_v59 = vadd.f32 %v718_v0, %v401_v2 }
 0x23a   :  { %v392_v22 = vpop.f32.mrf.mxu1 }
 0x23b   :  { %v393_v27 = vadd.f32 %v718_v0, %v392_v22 }
 0x23d   :  { %418 = vadd.xlane.f32.xlu1 %v393_v27 }
 0x23f   :  { %v404_v36 = vpop.f32.mrf.mxu2 }
 0x240   :  { %v405_v1 = vadd.f32 %v718_v0, %v404_v36 }
 0x243   :  { %v395_v28 = vpop.f32.mrf.mxu1 }
 0x244   :  { %v396_v26 = vadd.f32 %v718_v0, %v395_v28 }
 0x245   :  { %424 = vadd.xlane.f32.xlu1 %v402_v59 }
 0x246   :  { %420 = vadd.xlane.f32.xlu2 %v396_v26 }
 0x247   :  { %v407_v24 = vpop.f32.mrf.mxu2 }
 0x248   :  { %v410_v23 = vpop.f32.mrf.mxu3  ;;  %v408_v32 = vadd.f32 %v718_v0, %v407_v24 }
 0x249   :  { %v411_v47 = vadd.f32 %v718_v0, %v410_v23 }
 0x24b   :  { %v398_v61 = vpop.f32.mrf.mxu1 }
 0x24c   :  { %v399_v46 = vadd.f32 %v718_v0, %v398_v61 }
 0x24d   :  { %430 = vadd.xlane.f32.xlu1 %v411_v47 }
 0x24e   :  { %426 = vadd.xlane.f32.xlu2 %v405_v1  ;;  %422 = vadd.xlane.f32.xlu0 %v399_v46 }
 0x250   :  { %v413_v30 = vpop.f32.mrf.mxu3 }
 0x251   :  { %v414_v31 = vadd.f32 %v718_v0, %v413_v30 }
 0x256   :  { %432 = vadd.xlane.f32.xlu2 %v414_v31  ;;  %428 = vadd.xlane.f32.xlu0 %v408_v32 }
 0x2b0   :  { %v419_v33 = vpop.xlane.xlu1 %418 }
 0x2b1   :  { %v434_v34 = vmul.f32 0.03125, %v419_v33 }
 0x2b3   :  { %v1107_v35 = vsub.f32 %v393_v27, %v434_v34  ;;  %v474_v14 = vmul.f32 %v434_v34, %v434_v34 }
 0x2b5   :  { %v450_v37 = vmul.f32 %v1107_v35, %v1107_v35  ;;  %v482_v16 = vmul.f32 96.0, %v474_v14 }
 0x2b7   :  { %458 = vadd.xlane.f32.xlu0 %v450_v37 }
 0x2b8   :  { %v425_v38 = vpop.xlane.xlu1 %424 }
 0x2b9   :  { %v421_v40 = vpop.xlane.xlu2 %420  ;;  %v437_v25 = vmul.f32 0.03125, %v425_v38 }
 0x2ba   :  { %v435_v41 = vmul.f32 0.03125, %v421_v40 }
 0x2bb   :  { %v1111_v42 = vsub.f32 %v402_v59, %v437_v25  ;;  %v477_v3 = vmul.f32 %v437_v25, %v437_v25 }
 0x2bc   :  { %v1113_v43 = vsub.f32 %v396_v26, %v435_v41  ;;  %v475_v21 = vmul.f32 %v435_v41, %v435_v41 }
 0x2bd   :  { %v453_v49 = vmul.f32 %v1111_v42, %v1111_v42  ;;  %v485_v27 = vmul.f32 96.0, %v477_v3 }
 0x2be   :  { %v451_v48 = vmul.f32 %v1113_v43, %v1113_v43  ;;  %v483_v22 = vmul.f32 96.0, %v475_v21  ;;  %v1163_v21 = vld [vmem:[%s1232_s8] ss:$0 sm:$0xff] }
 0x2bf   :  { %464 = vadd.xlane.f32.xlu0 %v453_v49 }
 0x2c0   :  { %460 = vadd.xlane.f32.xlu1 %v451_v48  ;;  %v431_v51 = vpop.xlane.xlu1 %430 }
 0x2c1   :  { %v427_v29 = vpop.xlane.xlu2 %426  ;;  %v440_v52 = vmul.f32 0.03125, %v431_v51  ;;  %v423_v62 = vpop.xlane.xlu0 %422 }
 0x2c2   :  { %v438_v39 = vmul.f32 0.03125, %v427_v29  ;;  %v436_v63 = vmul.f32 0.03125, %v423_v62 }
 0x2c3   :  { %v1119_v44 = vsub.f32 %v411_v47, %v440_v52  ;;  %v480_v36 = vmul.f32 %v440_v52, %v440_v52 }
 0x2c4   :  { %v1121_v54 = vsub.f32 %v405_v1, %v438_v39  ;;  %v1123_v53 = vsub.f32 %v399_v46, %v436_v63  ;;  %v478_v23 = vmul.f32 %v438_v39, %v438_v39  ;;  %v476_v47 = vmul.f32 %v436_v63, %v436_v63 }
 0x2c5   :  { %v456_v58 = vmul.f32 %v1119_v44, %v1119_v44  ;;  %v488_v33 = vmul.f32 96.0, %v480_v36 }
 0x2c6   :  { %v454_v4 = vmul.f32 %v1121_v54, %v1121_v54  ;;  %v452_v55 = vmul.f32 %v1123_v53, %v1123_v53  ;;  %v484_v38 = vmul.f32 96.0, %v476_v47 }
 0x2c7   :  { %470 = vadd.xlane.f32.xlu0 %v456_v58 }
 0x2c8   :  { %466 = vadd.xlane.f32.xlu1 %v454_v4  ;;  %462 = vadd.xlane.f32.xlu2 %v452_v55 }
 0x2c9   :  { %v433_v57 = vpop.xlane.xlu2 %432  ;;  %v429_v8 = vpop.xlane.xlu0 %428 }
 0x2ca   :  { %v441_v7 = vmul.f32 0.03125, %v433_v57  ;;  %v439_v45 = vmul.f32 0.03125, %v429_v8 }
 0x2cc   :  { %v1131_v9 = vsub.f32 %v414_v31, %v441_v7  ;;  %v1133_v56 = vsub.f32 %v408_v32, %v439_v45  ;;  %v486_v32 = vmul.f32 96.0, %v478_v23  ;;  %v481_v39 = vmul.f32 %v441_v7, %v441_v7  ;;  %v1155_v7 = vld [vmem:[%s1231_s7] ss:$0 sm:$0xff]  ;;  %s808_s7 = smov [#allocation5]  }
 0x2cd   :  { %v479_v58 = vmul.f32 %v439_v45, %v439_v45  ;;  %s652_s8 = sshll.u32 %s808_s7, 4  ;;  %s653_s8 = int_to_ptr.vmem [resolvable:$true] %s652_s8 }
 0x2ce   :  { %v457_v50 = vmul.f32 %v1131_v9, %v1131_v9  ;;  %v455_v10 = vmul.f32 %v1133_v56, %v1133_v56 }
 0x2d0   :  { %472 = vadd.xlane.f32.xlu1 %v457_v50  ;;  %468 = vadd.xlane.f32.xlu2 %v455_v10 }
 0x32a   :  { %v459_v18 = vpop.xlane.xlu0 %458 }
 0x32b   :  { %v490_v20 = vsub.f32 %v459_v18, %v482_v16 }
 0x32d   :  { %v498_v60 = vmul.f32 0.03125, %v490_v20  ;;  %v489_v20 = vmul.f32 96.0, %v481_v39 }
 0x32f   :  { %v506_v0 = vadd.f32 1e-05, %v498_v60 }
 0x331   :  { %737 = vrsqrt.f32 %v506_v0  ;;  %vm520_vm10 = vweird.f32 %v506_v0 }
 0x332   :  { %v465_v28 = vpop.xlane.xlu0 %464 }
 0x333   :  { %v461_v2 = vpop.xlane.xlu1 %460  ;;  %v493_v26 = vsub.f32 %v465_v28, %v485_v27 }
 0x334   :  { %v491_v59 = vsub.f32 %v461_v2, %v483_v22  ;;  %v487_v22 = vmul.f32 96.0, %v479_v58 }
 0x335   :  { %v501_v1 = vmul.f32 0.03125, %v493_v26 }
 0x336   :  { %v499_v61 = vmul.f32 0.03125, %v491_v59 }
 0x337   :  { %v738_v46 = vpop.eup %737  ;;  %v1141_v24 = vadd.f32 1e-05, %v501_v1 }
 0x338   :  { %v1139_v30 = vadd.f32 1e-05, %v499_v61  ;;  %v515_v31 = vmul.f32 %v738_v46, %v506_v0  ;;  %vm521_vm9 = vweird.f32 %v738_v46 }
 0x339   :  { %vm522_vm11 = vmor %vm520_vm10, %vm521_vm9  ;;  %vm550_vm15 = vweird.f32 %v1141_v24 }
 0x33a   :  { %739 = vrsqrt.f32 %v1139_v30  ;;  %v516_v34 = vmul.f32 %v738_v46, %v515_v31  ;;  %v471_v40 = vpop.xlane.xlu0 %470  ;;  %vm530_vm13 = vweird.f32 %v1139_v30 }
 0x33b   :  { %741 = vrsqrt.f32 %v1141_v24  ;;  %v467_v37 = vpop.xlane.xlu1 %466  ;;  %v463_v41 = vpop.xlane.xlu2 %462  ;;  %v496_v48 = vsub.f32 %v471_v40, %v488_v33 }
 0x33c   :  { %v494_v25 = vsub.f32 %v467_v37, %v486_v32  ;;  %v517_v49 = vmul.f32 0.5, %v516_v34  ;;  %v492_v51 = vsub.f32 %v463_v41, %v484_v38 }
 0x33d   :  { %v504_v52 = vmul.f32 0.03125, %v496_v48 }
 0x33e   :  { %v502_v29 = vmul.f32 0.03125, %v494_v25  ;;  %v518_v62 = vsub.f32 1.5, %v517_v49  ;;  %v500_v63 = vmul.f32 0.03125, %v492_v51 }
 0x33f   :  { %v1147_v57 = vadd.f32 1e-05, %v504_v52 }
 0x340   :  { %v740_v4 = vpop.eup %739  ;;  %v1145_v55 = vadd.f32 1e-05, %v502_v29  ;;  %v519_v50 = vmul.f32 %v738_v46, %v518_v62  ;;  %v1150_v14 = vadd.f32 1e-05, %v500_v63 }
 0x341   :  { %v742_v8 = vpop.eup %741  ;;  %v525_v10 = vmul.f32 %v740_v4, %v1139_v30  ;;  %vm531_vm12 = vweird.f32 %v740_v4  ;;  %vm580_vm9 = vweird.f32 %v1147_v57 }
 0x342   :  { %v545_v16 = vmul.f32 %v742_v8, %v1141_v24  ;;  %743 = vrsqrt.f32 %v1145_v55  ;;  %v523_v45 = vsel %vm522_vm11, %v738_v46, %v519_v50  ;;  %vm551_vm14 = vweird.f32 %v742_v8  ;;  %vm532_vm0 = vmor %vm530_vm13, %vm531_vm12 }
 0x343   :  { %v526_v18 = vmul.f32 %v740_v4, %v525_v10  ;;  %745 = vrsqrt.f32 %v1150_v14  ;;  %v473_v3 = vpop.xlane.xlu1 %472  ;;  %v594_v60 = vmul.f32 %v523_v45, %v1107_v35  ;;  %v469_v27 = vpop.xlane.xlu2 %468  ;;  %vm552_vm1 = vmor %vm550_vm15, %vm551_vm14  ;;  %vm560_vm2 = vweird.f32 %v1145_v55 }
 0x344   :  { %v546_v0 = vmul.f32 %v742_v8, %v545_v16  ;;  %747 = vrsqrt.f32 %v1147_v57  ;;  %v497_v28 = vsub.f32 %v473_v3, %v489_v20  ;;  %v495_v36 = vsub.f32 %v469_v27, %v487_v22 }
 0x345   :  { %v527_v2 = vmul.f32 0.5, %v526_v18  ;;  %v605_v59 = vmul.f32 %v1155_v7, %v594_v60  ;;  %vm540_vm7 = vweird.f32 %v1150_v14 }
 0x346   :  { %v547_v26 = vmul.f32 0.5, %v546_v0  ;;  %v505_v61 = vmul.f32 0.03125, %v497_v28  ;;  %v503_v25 = vmul.f32 0.03125, %v495_v36 }
 0x347   :  { %v528_v23 = vsub.f32 1.5, %v527_v2  ;;  %v616_v47 = vadd.f32 %v1163_v21, %v605_v59 }
 0x348   :  { %v744_v1 = vpop.eup %743  ;;  %v548_v35 = vsub.f32 1.5, %v547_v26  ;;  %v1172_v33 = vadd.f32 1e-05, %v505_v61 }
 0x349   :  { %v746_v46 = vpop.eup %745  ;;  %v529_v31 = vmul.f32 %v740_v4, %v528_v23  ;;  %v555_v32 = vmul.f32 %v744_v1, %v1145_v55  ;;  %v624_v37 = vadd.f32 %v616_v47, %v881_v5  ;;  %vm561_vm3 = vweird.f32 %v744_v1 }
 0x34a   :  { %v748_v34 = vpop.eup %747  ;;  %v549_v38 = vmul.f32 %v742_v8, %v548_v35  ;;  %v535_v40 = vmul.f32 %v746_v46, %v1150_v14  ;;  %749 = vrsqrt.f32 %v1172_v33  ;;  %vm541_vm4 = vweird.f32 %v746_v46  ;;  %vm562_vm6 = vmor %vm560_vm2, %vm561_vm3 }
 0x34b   :  { %v533_v41 = vsel %vm532_vm0, %v740_v4, %v529_v31  ;;  %v556_v30 = vmul.f32 %v744_v1, %v555_v32  ;;  %v575_v48 = vmul.f32 %v748_v34, %v1147_v57  ;;  %v632_v49 = vmax.f32 %v624_v37, 0.0  ;;  %vm542_vm8 = vmor %vm540_vm7, %vm541_vm4 }
 0x34c   :  { %v595_v24 = vmul.f32 %v533_v41, %v1113_v43  ;;  %v553_v51 = vsel %vm552_vm1, %v742_v8, %v549_v38  ;;  %v536_v29 = vmul.f32 %v746_v46, %v535_v40  ;;  %v1182_v4 = vadd.f32 1e-05, %v503_v25 }
 0x34d   :  { %v597_v52 = vmul.f32 %v553_v51, %v1111_v42  ;;  %v557_v39 = vmul.f32 0.5, %v556_v30  ;;  %v576_v62 = vmul.f32 %v748_v34, %v575_v48  ;;  %640 = vst [vmem:[#allocation5] sm:$0xff] %v632_v49  ;;  %vm581_vm5 = vweird.f32 %v748_v34 }
 0x34e   :  { %v606_v5 = vmul.f32 %v1155_v7, %v595_v24  ;;  %v537_v63 = vmul.f32 0.5, %v536_v29  ;;  %751 = vrsqrt.f32 %v1182_v4  ;;  %vm582_vm10 = vmor %vm580_vm9, %vm581_vm5  ;;  %vm590_vm12 = vweird.f32 %v1172_v33 }
 0x34f   :  { %v608_v58 = vmul.f32 %v1155_v7, %v597_v52  ;;  %v558_v50 = vsub.f32 1.5, %v557_v39  ;;  %v577_v43 = vmul.f32 0.5, %v576_v62  ;;  %vm570_vm15 = vweird.f32 %v1182_v4 }
 0x350   :  { %v617_v8 = vadd.f32 %v1163_v21, %v606_v5  ;;  %v538_v42 = vsub.f32 1.5, %v537_v63  ;;  %v750_v3 = vpop.eup %749 }
 0x351   :  { %v619_v10 = vadd.f32 %v1163_v21, %v608_v58  ;;  %v559_v16 = vmul.f32 %v744_v1, %v558_v50  ;;  %v578_v45 = vsub.f32 1.5, %v577_v43  ;;  %vm591_vm11 = vweird.f32 %v750_v3 }
 0x352   :  { %v625_v18 = vadd.f32 %v617_v8, %v884_v6  ;;  %v539_v20 = vmul.f32 %v746_v46, %v538_v42  ;;  %v585_v6 = vmul.f32 %v750_v3, %v1172_v33  ;;  %vm592_vm13 = vmor %vm590_vm12, %vm591_vm11 }
 0x353   :  { %v627_v60 = vadd.f32 %v619_v10, %v902_v12  ;;  %v563_v0 = vsel %vm562_vm6, %v744_v1, %v559_v16  ;;  %v579_v22 = vmul.f32 %v748_v34, %v578_v45 }
 0x354   :  { %v633_v27 = vmax.f32 %v625_v18, 0.0  ;;  %v598_v2 = vmul.f32 %v563_v0, %v1121_v54  ;;  %v543_v28 = vsel %vm542_vm8, %v746_v46, %v539_v20  ;;  %v752_v14 = vpop.eup %751  ;;  %v586_v23 = vmul.f32 %v750_v3, %v585_v6 }
 0x355   :  { %v635_v55 = vmax.f32 %v627_v60, 0.0  ;;  %v596_v59 = vmul.f32 %v543_v28, %v1123_v53  ;;  %v583_v26 = vsel %vm582_vm10, %v748_v34, %v579_v22  ;;  %v565_v54 = vmul.f32 %v752_v14, %v1182_v4 }
 0x356   :  { %641 = vst [vmem:[#allocation5 + $0x8] sm:$0xff] %v633_v27  ;;  %v609_v12 = vmul.f32 %v1155_v7, %v598_v2  ;;  %v600_v36 = vmul.f32 %v583_v26, %v1119_v44  ;;  %v587_v47 = vmul.f32 0.5, %v586_v23  ;;  %vm571_vm14 = vweird.f32 %v752_v14 }
 0x357   :  { %643 = vst [vmem:[#allocation5 + $0x18] sm:$0xff] %v635_v55  ;;  %v607_v57 = vmul.f32 %v1155_v7, %v596_v59  ;;  %v566_v35 = vmul.f32 %v752_v14, %v565_v54  ;;  %vm572_vm0 = vmor %vm570_vm15, %vm571_vm14 }
 0x358   :  { %v620_v61 = vadd.f32 %v1163_v21, %v609_v12  ;;  %v611_v1 = vmul.f32 %v1155_v7, %v600_v36  ;;  %v588_v32 = vsub.f32 1.5, %v587_v47 }
 0x359   :  { %v618_v53 = vadd.f32 %v1163_v21, %v607_v57  ;;  %v567_v34 = vmul.f32 0.5, %v566_v35 }
 0x35a   :  { %v628_v46 = vadd.f32 %v620_v61, %v913_v15  ;;  %v622_v31 = vadd.f32 %v1163_v21, %v611_v1  ;;  %v589_v40 = vmul.f32 %v750_v3, %v588_v32 }
 0x35b   :  { %v626_v44 = vadd.f32 %v618_v53, %v899_v11  ;;  %v568_v41 = vsub.f32 1.5, %v567_v34 }
 0x35c   :  { %v636_v37 = vmax.f32 %v628_v46, 0.0  ;;  %v630_v38 = vadd.f32 %v622_v31, %v905_v13  ;;  %v593_v15 = vsel %vm592_vm13, %v750_v3, %v589_v40 }
 0x35d   :  { %v634_v25 = vmax.f32 %v626_v44, 0.0  ;;  %v601_v48 = vmul.f32 %v593_v15, %v1131_v9  ;;  %v569_v49 = vmul.f32 %v752_v14, %v568_v41 }
 0x35e   :  { %644 = vst [vmem:[#allocation5 + $0x20] sm:$0xff] %v636_v37  ;;  %v638_v30 = vmax.f32 %v630_v38, 0.0 }
 0x35f   :  { %642 = vst [vmem:[#allocation5 + $0x10] sm:$0xff] %v634_v25  ;;  %v612_v11 = vmul.f32 %v1155_v7, %v601_v48  ;;  %v573_v13 = vsel %vm572_vm0, %v752_v14, %v569_v49 }
 0x360   :  { %646 = vst [vmem:[#allocation5 + $0x30] sm:$0xff] %v638_v30  ;;  %v599_v33 = vmul.f32 %v573_v13, %v1133_v56 }
 0x361   :  { %v623_v24 = vadd.f32 %v1163_v21, %v612_v11 }
 0x362   :  { %v610_v51 = vmul.f32 %v1155_v7, %v599_v33 }
 0x363   :  { %v631_v29 = vadd.f32 %v623_v24, %v919_v17 }
 0x364   :  { %v621_v52 = vadd.f32 %v1163_v21, %v610_v51 }
 0x365   :  { %v639_v39 = vmax.f32 %v631_v29, 0.0 }
 0x366   :  { %v629_v9 = vadd.f32 %v621_v52, %v927_v19 }
 0x367   :  { %647 = vst [vmem:[#allocation5 + $0x38] sm:$0xff] %v639_v39 }
 0x368   :  { %v637_v62 = vmax.f32 %v629_v9, 0.0 }
 0x36a   :  { %645 = vst [vmem:[#allocation5 + $0x28] sm:$0xff] %v637_v62 }
 0x36b   :  { %660 = dma.vmem_to_hbm [thread:$0]  %s653_s8, 1024, %s655_s27, [#allocation4], %s806_s14, %s806_s14, %s807_s15  }
 0x36c   :  { %803 = dma.done.wait [#allocation4], 1024  }
 0x36d   :  { %804 = vsyncadd [#allocation4], 4294966272 }
 0x36e   :  { %665 = vsyncpa [#allocation3], 1 }
 0x36f   :  { %666 = vsyncpa [#allocation4], 1 }

</bundles_post_ra>
